<compile_context>
chip_gen: v6e
topology: v6e:2x2x1
jax: 0.10.0
libtpu: 0.0.40
codegen_flags: <defaults>
</compile_context>

<pallas_src>
import jax
import jax.numpy as jnp
from jax.experimental import pallas as pl
from jax.experimental.pallas import tpu as pltpu

IN_FEATURES = 30  # fixed by the module: w_1/w_2 are (30, output_dim)

_LANE = 128
_SUBLANE = 8


def _round_up(v, m):
    return (v + m - 1) // m * m


def _gaussian_kernel(x_ref, w1_ref, w2_ref, b1_ref, b2_ref, mu_ref, sig_ref):
    x = x_ref[...]
    # Two small MXU matmuls (K=30); the kernel is HBM-bound, MXU work is noise.
    mu = jnp.dot(x, w1_ref[...], preferred_element_type=jnp.float32) + b1_ref[...]
    s = jnp.dot(x, w2_ref[...], preferred_element_type=jnp.float32) + b2_ref[...]
    # Numerically stable softplus(+1e-6); exp/log1p go to the EUP slot and are
    # only computed for the sigma head.
    sp = jnp.maximum(s, 0.0) + jnp.log1p(jnp.exp(-jnp.abs(s))) + 1e-6
    mu_ref[...] = mu.astype(mu_ref.dtype)
    sig_ref[...] = sp.astype(sig_ref.dtype)


def _vmem_capacity_bytes():
    try:
        return int(pltpu.get_tpu_info().vmem_capacity_bytes)
    except Exception:
        return 64 << 20  # conservative default (v7x per-TC VMEM)


def gaussian_layer(x, w1, w2, b1, b2, *, single_shot_max_b=512, max_block_b=2048):
    """Pallas implementation of GaussianLayer.forward.

    x : (B, 30) float32
    w1, w2 : (30, D) float32
    b1, b2 : (D,) float32
    returns [mu (B, D), sig_pos (B, D)]
    """
    B, F = x.shape
    D = w1.shape[1]
    assert F == IN_FEATURES and w1.shape == (F, D) and w2.shape == (F, D)
    assert b1.shape == (D,) and b2.shape == (D,)

    x = x.astype(jnp.float32)
    w1 = w1.astype(jnp.float32)
    w2 = w2.astype(jnp.float32)
    b1r = b1.reshape(1, D).astype(jnp.float32)
    b2r = b2.reshape(1, D).astype(jnp.float32)

    out_shapes = (
        jax.ShapeDtypeStruct((B, D), jnp.float32),
        jax.ShapeDtypeStruct((B, D), jnp.float32),
    )

    if B <= single_shot_max_b:
        # Single-shot path: whole problem VMEM-resident, no grid -> no
        # pipeline prologue/epilogue for tiny batches.
        mu, sig = pl.pallas_call(
            _gaussian_kernel,
            out_shape=out_shapes,
            in_specs=[pl.BlockSpec(memory_space=pltpu.MemorySpace.VMEM)] * 5,
            out_specs=(
                pl.BlockSpec(memory_space=pltpu.MemorySpace.VMEM),
                pl.BlockSpec(memory_space=pltpu.MemorySpace.VMEM),
            ),
        )(x, w1, w2, b1r, b2r)
        return [mu, sig]

    # ---- tiled path over the batch ----
    # VMEM footprint per batch row (layout pads the lane dim to 128).
    d_pad = _round_up(D, _LANE)
    f_pad = _round_up(F, _LANE)
    row_bytes = (f_pad + 2 * d_pad) * 4  # x tile + mu tile + sig tile, f32

    vmem_cap = _vmem_capacity_bytes()
    # ~3/8 of VMEM for (double-buffered) tiles: 24 MiB on v7x, 48 MiB on
    # 128-MiB chips.
    tile_budget = max(8 << 20, min((vmem_cap * 3) // 8, 48 << 20))
    tb_vmem = max(_SUBLANE, (tile_budget // (2 * row_bytes)) // _SUBLANE * _SUBLANE)
    # Cap at max_block_b and at ceil(B/2) so there are always >= 2 tiles
    # (keeps both v7x TensorCores busy for medium batches).
    tb = min(max_block_b, tb_vmem, _round_up(pl.cdiv(B, 2), _SUBLANE))
    tb = max(tb, _SUBLANE)
    num_tiles = pl.cdiv(B, tb)  # partial last tile handled by Pallas masking

    # VMEM request: double-buffered tiles + (conservatively double-buffered)
    # resident weights/bias, with 2x headroom; clamped to stay well inside the
    # physical capacity of the current generation.
    w_bytes = 2 * _round_up(F, _SUBLANE) * d_pad * 4
    b_bytes = 2 * _SUBLANE * d_pad * 4
    need = 2 * tb * row_bytes + 2 * (w_bytes + b_bytes)
    vmem_limit = int(max(16 << 20, min(2 * need, 48 << 20, vmem_cap - (8 << 20))))

    mu, sig = pl.pallas_call(
        _gaussian_kernel,
        out_shape=out_shapes,
        grid=(num_tiles,),
        in_specs=[
            pl.BlockSpec((tb, F), lambda i: (i, 0)),   # x tile
            pl.BlockSpec((F, D), lambda i: (0, 0)),    # w1 (VMEM-resident)
            pl.BlockSpec((F, D), lambda i: (0, 0)),    # w2 (VMEM-resident)
            pl.BlockSpec((1, D), lambda i: (0, 0)),    # b1 (VMEM-resident)
            pl.BlockSpec((1, D), lambda i: (0, 0)),    # b2 (VMEM-resident)
        ],
        out_specs=(
            pl.BlockSpec((tb, D), lambda i: (i, 0)),   # mu tile
            pl.BlockSpec((tb, D), lambda i: (i, 0)),   # sigma tile
        ),
        compiler_params=pltpu.CompilerParams(
            dimension_semantics=("parallel",),  # megacore sharding on v7x
            vmem_limit_bytes=vmem_limit,
        ),
    )(x, w1, w2, b1r, b2r)
    return [mu, sig]


def gaussian_layer_ref(x, w1, w2, b1, b2):
    # Matches the PyTorch module's naive forward (used as the spec oracle).
    mu = x @ w1 + b1
    sig = x @ w2 + b2
    return [mu, jnp.log(1.0 + jnp.exp(sig)) + 1e-06]


if __name__ == "__main__":
    key = jax.random.PRNGKey(0)
    k_x, k_w1, k_w2, k_b1, k_b2, k_xbig = jax.random.split(key, 6)

    output_dim = 32

    # Deterministic "normal_()" style parameter init (synthetic weights).
    w1 = jax.random.normal(k_w1, (IN_FEATURES, output_dim), dtype=jnp.float32)
    w2 = jax.random.normal(k_w2, (IN_FEATURES, output_dim), dtype=jnp.float32)
    b1 = jax.random.normal(k_b1, (output_dim,), dtype=jnp.float32)
    b2 = jax.random.normal(k_b2, (output_dim,), dtype=jnp.float32)

    # Small batch -> single-shot (no-grid) path.
    x_small = jax.random.normal(k_x, (8, IN_FEATURES), dtype=jnp.float32)
    mu_s, sig_s = gaussian_layer(x_small, w1, w2, b1, b2)
    jax.block_until_ready(mu_s)
    jax.block_until_ready(sig_s)
    mu_ref, sig_ref = gaussian_layer_ref(x_small, w1, w2, b1, b2)
    assert jnp.allclose(mu_s, mu_ref, atol=1e-4, rtol=1e-4)
    assert jnp.allclose(sig_s, sig_ref, atol=1e-4, rtol=1e-4)
    assert bool(jnp.all(sig_s > 0))

    # Larger, non-divisible batch -> tiled path with a partial last tile
    # (no host-side padding/slicing).
    x_big = jax.random.normal(k_xbig, (1029, IN_FEATURES), dtype=jnp.float32)
    mu_b, sig_b = gaussian_layer(x_big, w1, w2, b1, b2)
    jax.block_until_ready(mu_b)
    jax.block_until_ready(sig_b)
    mu_refb, sig_refb = gaussian_layer_ref(x_big, w1, w2, b1, b2)
    assert jnp.allclose(mu_b, mu_refb, atol=1e-4, rtol=1e-4)
    assert jnp.allclose(sig_b, sig_refb, atol=1e-4, rtol=1e-4)
    assert bool(jnp.all(sig_b > 0))

    print("KERNEL_OK")
</pallas_src>

<mosaic_0001>
module attributes {stable_mosaic.version = 11 : i64} {
  func.func @_gaussian_kernel(%arg0: memref<8x30xf32, #tpu.memory_space<vmem>>, %arg1: memref<30x32xf32, #tpu.memory_space<vmem>>, %arg2: memref<30x32xf32, #tpu.memory_space<vmem>>, %arg3: memref<1x32xf32, #tpu.memory_space<vmem>>, %arg4: memref<1x32xf32, #tpu.memory_space<vmem>>, %arg5: memref<8x32xf32, #tpu.memory_space<vmem>>, %arg6: memref<8x32xf32, #tpu.memory_space<vmem>>) attributes {dimension_semantics = [], scalar_prefetch = 0 : i64, scratch_operands = 0 : i64, tpu.core_type = #tpu.core_type<tc>} {
    %c0 = arith.constant 0 : index
    %c0_0 = arith.constant 0 : index
    %0 = vector.load %arg0[%c0, %c0_0] : memref<8x30xf32, #tpu.memory_space<vmem>>, vector<8x30xf32>
    %c0_1 = arith.constant 0 : index
    %c0_2 = arith.constant 0 : index
    %1 = vector.load %arg1[%c0_1, %c0_2] : memref<30x32xf32, #tpu.memory_space<vmem>>, vector<30x32xf32>
    %cst = arith.constant dense<0.000000e+00> : vector<8x32xf32>
    %2 = tpu.matmul %0, %1, %cst {dimension_numbers = #tpu.dot_dimension_numbers<[1], [0], [0], [1], [0, 0, 1, 1], [], []>} : vector<8x30xf32>, vector<30x32xf32>, vector<8x32xf32> -> vector<8x32xf32>
    %c0_3 = arith.constant 0 : index
    %c0_4 = arith.constant 0 : index
    %3 = vector.load %arg3[%c0_3, %c0_4] : memref<1x32xf32, #tpu.memory_space<vmem>>, vector<1x32xf32>
    %4 = vector.broadcast %3 : vector<1x32xf32> to vector<8x32xf32>
    %5 = arith.addf %2, %4 : vector<8x32xf32>
    %c0_5 = arith.constant 0 : index
    %c0_6 = arith.constant 0 : index
    %6 = vector.load %arg2[%c0_5, %c0_6] : memref<30x32xf32, #tpu.memory_space<vmem>>, vector<30x32xf32>
    %cst_7 = arith.constant dense<0.000000e+00> : vector<8x32xf32>
    %7 = tpu.matmul %0, %6, %cst_7 {dimension_numbers = #tpu.dot_dimension_numbers<[1], [0], [0], [1], [0, 0, 1, 1], [], []>} : vector<8x30xf32>, vector<30x32xf32>, vector<8x32xf32> -> vector<8x32xf32>
    %c0_8 = arith.constant 0 : index
    %c0_9 = arith.constant 0 : index
    %8 = vector.load %arg4[%c0_8, %c0_9] : memref<1x32xf32, #tpu.memory_space<vmem>>, vector<1x32xf32>
    %9 = vector.broadcast %8 : vector<1x32xf32> to vector<8x32xf32>
    %10 = arith.addf %7, %9 : vector<8x32xf32>
    %cst_10 = arith.constant 0.000000e+00 : f32
    %11 = vector.broadcast %cst_10 : f32 to vector<8x32xf32>
    %12 = arith.maximumf %10, %11 : vector<8x32xf32>
    %13 = math.absf %10 : vector<8x32xf32>
    %cst_11 = arith.constant 0.000000e+00 : f32
    %14 = vector.broadcast %cst_11 : f32 to vector<8x32xf32>
    %15 = arith.subf %14, %13 : vector<8x32xf32>
    %16 = math.exp %15 : vector<8x32xf32>
    %17 = math.log1p %16 : vector<8x32xf32>
    %18 = arith.addf %12, %17 : vector<8x32xf32>
    %cst_12 = arith.constant 9.99999997E-7 : f32
    %19 = vector.broadcast %cst_12 : f32 to vector<8x32xf32>
    %20 = arith.addf %18, %19 : vector<8x32xf32>
    %c0_13 = arith.constant 0 : index
    %c0_14 = arith.constant 0 : index
    %21 = vector.load %arg5[%c0_13, %c0_14] : memref<8x32xf32, #tpu.memory_space<vmem>>, vector<8x32xf32>
    tpu.vector_store %arg5[%c0_13, %c0_14], %5 {strides = array<i32>} : memref<8x32xf32, #tpu.memory_space<vmem>>, vector<8x32xf32>,
    %c0_15 = arith.constant 0 : index
    %c0_16 = arith.constant 0 : index
    %22 = vector.load %arg6[%c0_15, %c0_16] : memref<8x32xf32, #tpu.memory_space<vmem>>, vector<8x32xf32>
    tpu.vector_store %arg6[%c0_15, %c0_16], %20 {strides = array<i32>} : memref<8x32xf32, #tpu.memory_space<vmem>>, vector<8x32xf32>,
    return
  }
}

</mosaic_0001>

<bundles_post_ra>
// kernel: tpu_custom_call.1
= control target key start
LH: loop header
LB: loop body
LE: loop exit
PB: predicated region body
PF: predicated region fallthrough
CT: control target
= control target key end

     0   :  { %12 = vsyncpa [#allocation3], 0  ;;  %s512_s0 = inlined_call_operand.hbm [shape: f32[8,30], index: 0, kind: input, shape index: {}]   ;;  %s513_s1 = inlined_call_operand.hbm [shape: f32[30,32], index: 1, kind: input, shape index: {}]   ;;  %s514_s2 = inlined_call_operand.hbm [shape: f32[30,32], index: 2, kind: input, shape index: {}]   ;;  %s515_s3 = inlined_call_operand.vmem [shape: f32[1,32], index: 3, kind: input, shape index: {}]   ;;  %s516_s4 = inlined_call_operand.vmem [shape: f32[1,32], index: 4, kind: input, shape index: {}]   ;;  %s517_s5 = inlined_call_operand.hbm [shape: f32[8,32], index: 5, kind: output, shape index: {0}]   ;;  %s518_s6 = inlined_call_operand.hbm [shape: f32[8,32], index: 6, kind: output, shape index: {1}]  }
   0x1   :  { %13 = vsyncpa [#allocation6], 0 }
   0x2   :  { %14 = vsyncpa [#allocation4], 0 }
   0x3   :  { %15 = vsyncpa [#allocation10], 0  ;;  %s445_s21 = smov [#allocation5]  }
   0x4   :  { %s31_s22 = sshll.u32 %s445_s21, 4  ;;  %s32_s22 = int_to_ptr.vmem [resolvable:$true] %s31_s22 }
   0x5   :  { %s345_s23 = scalar_lea.vmem %s32_s22, 512  ;;  %p350_p1 = scmp.lt.s32.totalorder %s32_s22, %s32_s22 }
   0x6   :  { %p346_p0 = scmp.ne.s32.totalorder %s32_s22, %s345_s23  ;;  %p351_p2 = scmp.lt.s32.totalorder %s345_s23, %s345_s23 }
   0x8   :  { %p352_p3 = por %p351_p2, %p350_p1 }
   0xa   :  { %p353_p4 = pnand %p352_p3, %p346_p0 }
   0xc   :  { %356 = shalt.err (!%p353_p4)
}
   0xd   :  { %s446_s24 = smov 128   ;;  %s447_s25 = smov 8  }
   0xe   :  { %37 = dma.hbm_to_vmem [thread:$0]  %s513_s1, 512, %s32_s22, [#allocation6], %s446_s24, %s446_s24, %s447_s25  }
   0xf   :  { %s448_s28 = smov [#allocation2]   ;;  %s449_s30 = smov [#allocation7]  }
  0x10   :  { %s22_s29 = sshll.u32 %s448_s28, 4  ;;  %s43_s7 = sshll.u32 %s449_s30, 4  ;;  %s23_s29 = int_to_ptr.vmem [resolvable:$true] %s22_s29  ;;  %s44_s7 = int_to_ptr.vmem [resolvable:$true] %s43_s7 }
  0x11   :  { %s365_s8 = scalar_lea.vmem %s23_s29, 128  ;;  %p370_p6 = scmp.lt.s32.totalorder %s23_s29, %s23_s29 }
  0x12   :  { %p366_p5 = scmp.ne.s32.totalorder %s23_s29, %s365_s8  ;;  %p371_p7 = scmp.lt.s32.totalorder %s365_s8, %s365_s8 }
  0x14   :  { %p372_p8 = por %p371_p7, %p370_p6 }
  0x16   :  { %p373_p9 = pnand %p372_p8, %p366_p5 }
  0x18   :  { %376 = shalt.err (!%p373_p9)
}
  0x19   :  { %25 = dma.hbm_to_vmem [thread:$0]  %s512_s0, 128, %s23_s29, [#allocation3]  }
  0x1a   :  { %s385_s11 = scalar_lea.vmem %s44_s7, 512  ;;  %p390_p11 = scmp.lt.s32.totalorder %s44_s7, %s44_s7 }
  0x1b   :  { %p386_p10 = scmp.ne.s32.totalorder %s44_s7, %s385_s11  ;;  %p391_p12 = scmp.lt.s32.totalorder %s385_s11, %s385_s11 }
  0x1d   :  { %p392_p13 = por %p391_p12, %p390_p11 }
  0x1f   :  { %p393_p0 = pnand %p392_p13, %p386_p10 }
  0x21   :  { %396 = shalt.err (!%p393_p0)
}
  0x22   :  { %49 = dma.hbm_to_vmem [thread:$0]  %s514_s2, 512, %s44_s7, [#allocation6], %s446_s24, %s446_s24, %s447_s25  }
  0x23   :  { %437 = dma.done.wait [#allocation3], 128  }
  0x24   :  { %438 = vsyncadd [#allocation3], 4294967168 }
  0x25   :  { %439 = dma.done.wait [#allocation6], 1024  }
  0x26   :  { %440 = vsyncadd [#allocation6], 4294966272  ;;  %v450_v0 = vmov 0.0   ;;  %vm451_vm0 = vmmov 0   ;;  %vm79_vm1 = vcmask 1045504   ;;  %v155_v2 = vld [vmem:[#allocation7 + $0x10] sm:$0xff] }
  0x27   :  { %313 = vmatprep.subr.mxu1 %v450_v0  ;;  %321 = vmatprep.mubr.msk.f32.mxu1 %vm451_vm0, %v450_v0  ;;  %v156_v1 = vld [vmem:[#allocation7 + $0x18] sm:$0x3f]  ;;  %v154_v4 = vld [vmem:[#allocation7 + $0x8] sm:$0xff]  ;;  %v66_v5 = vld [vmem:[#allocation5 + $0x10] sm:$0xff]  ;;  %vm75_vm2 = vcmask 244736   ;;  %s452_s15 = smov [#allocation8]  }
  0x28   :  { %302 = vmatprep.subr.mxu0 %v450_v0  ;;  %310 = vmatprep.mubr.msk.f32.mxu0 %vm451_vm0, %v450_v0  ;;  %v67_v3 = vld [vmem:[#allocation5 + $0x18] sm:$0x3f]  ;;  %v65_v6 = vld [vmem:[#allocation5 + $0x8] sm:$0xff]  ;;  %v153_v7 = vld [vmem:[#allocation7] sm:$0xff]  ;;  %s262_s16 = sshll.u32 %s452_s15, 4  ;;  %vm253_vm3 = vcmask 261120   ;;  %s263_s16 = int_to_ptr.vmem [resolvable:$true] %s262_s16 }
  0x29   :  { %314 = vmatpush3.msk.msra.mxu1 %vm79_vm1, %v156_v1  ;;  %303 = vmatpush3.msk.msra.mxu0 %vm79_vm1, %v67_v3  ;;  %v63_v8 = vld [vmem:[#allocation2] sm:$0xff]  ;;  %v64_v9 = vld [vmem:[#allocation5] sm:$0xff]  ;;  %s397_s17 = scalar_lea.vmem %s263_s16, 128  ;;  %p402_p2 = scmp.lt.s32.totalorder %s263_s16, %s263_s16 }
  0x2a   :  { %315 = vmatprep.subr.mxu1 %v450_v0  ;;  %304 = vmatprep.subr.mxu0 %v450_v0  ;;  %v289_v10 = vld [vmem:[%s516_s4] ss:$0 sm:$0xff]  ;;  %p398_p1 = scmp.ne.s32.totalorder %s263_s16, %s397_s17  ;;  %p403_p3 = scmp.lt.s32.totalorder %s397_s17, %s397_s17 }
  0x2b   :  { %316 = vmatpush3.msra.mxu1 %v155_v2  ;;  %305 = vmatpush3.msra.mxu0 %v66_v5  ;;  %v286_v11 = vld [vmem:[%s515_s3] ss:$0 sm:$0xff] }
  0x2c   :  { %317 = vmatprep.subr.mxu1 %v450_v0  ;;  %306 = vmatprep.subr.mxu0 %v450_v0  ;;  %p404_p4 = por %p403_p3, %p402_p2 }
  0x2d   :  { %318 = vmatpush3.msra.mxu1 %v154_v4  ;;  %307 = vmatpush3.msra.mxu0 %v65_v6 }
  0x2e   :  { %319 = vmatprep.subr.mxu1 %v450_v0  ;;  %308 = vmatprep.subr.mxu0 %v450_v0  ;;  %p405_p5 = pnand %p404_p4, %p398_p1 }
  0x2f   :  { %320 = vmatpush3.msra.mxu1 %v153_v7  ;;  %309 = vmatpush3.msra.mxu0 %v64_v9 }
  0x30   :  { %322 = vmatmul.mubr.msk.f32.vlgmr.msra.gmra.mxu1 %vm75_vm2, %v63_v8  ;;  %311 = vmatmul.mubr.msk.f32.vlgmr.msra.gmra.mxu0 %vm75_vm2, %v63_v8 }
  0xf0   :  { %v233_v12 = vpop.f32.mrf.mxu1  ;;  %v149_v14 = vpop.f32.mrf.mxu0 }
  0xf1   :  { %v234_v13 = vadd.f32 %v289_v10, %v233_v12  ;;  %v150_v16 = vadd.f32 %v286_v11, %v149_v14 }
  0xf2   :  { %v323_v15 = vpop.f32.mrf.mxu1  ;;  %v312_v18 = vpop.f32.mrf.mxu0 }
  0xf3   :  { %v238_v17 = vand.u32 2147483647, %v234_v13  ;;  %254 = vst.msk [vmem:[#allocation8] sm:$0xff] %vm253_vm3, %v150_v16 }
  0xf5   :  { %v239_v19 = vsub.f32 0.0, %v238_v17 }
  0xf6   :  { %408 = shalt.err (!%p405_p5)
}
  0xf7   :  { %265 = dma.vmem_to_hbm [thread:$0]  %s263_s16, 128, %s517_s5, [#allocation4]   ;;  %v240_v20 = vmul.f32 1.442695, %v239_v19  ;;  %v237_v29 = vmax.f32 %v234_v13, 0.0 }
  0xf8   :  { %s453_s18 = smov [#allocation9]  }
  0xf9   :  { %333 = vpow2.f32 %v240_v20  ;;  %s272_s19 = sshll.u32 %s453_s18, 4  ;;  %s273_s19 = int_to_ptr.vmem [resolvable:$true] %s272_s19 }
  0xfa   :  { %s417_s5 = scalar_lea.vmem %s273_s19, 128  ;;  %p422_p7 = scmp.lt.s32.totalorder %s273_s19, %s273_s19 }
  0xfb   :  { %p418_p6 = scmp.ne.s32.totalorder %s273_s19, %s417_s5  ;;  %p423_p8 = scmp.lt.s32.totalorder %s417_s5, %s417_s5 }
  0xfd   :  { %p424_p9 = por %p423_p8, %p422_p7 }
  0xff   :  { %p425_p10 = pnand %p424_p9, %p418_p6 }
 0x106   :  { %v334_v21 = vpop.eup %333 }
 0x107   :  { %v242_v22 = vadd.f32 1.0, %v334_v21  ;;  %v245_v23 = vmul.f32 -0.5, %v334_v21  ;;  %v248_v25 = vand.u32 2147483647, %v334_v21 }
 0x109   :  { %335 = vlog2.f32 %v242_v22  ;;  %v246_v24 = vadd.f32 1.0, %v245_v23  ;;  %vm249_vm4 = vcmp.lt.f32.partialorder %v248_v25, 0.0004427343 }
 0x10b   :  { %v247_v28 = vmul.f32 %v334_v21, %v246_v24 }
 0x116   :  { %v336_v26 = vpop.eup %335 }
 0x117   :  { %v244_v27 = vmul.f32 0.6931472, %v336_v26 }
 0x119   :  { %v250_v30 = vsel %vm249_vm4, %v247_v28, %v244_v27 }
 0x11a   :  { %v251_v31 = vadd.f32 %v250_v30, %v237_v29 }
 0x11c   :  { %v252_v32 = vadd.f32 1e-06, %v251_v31 }
 0x11e   :  { %255 = vst.msk [vmem:[#allocation9] sm:$0xff] %vm253_vm3, %v252_v32 }
 0x11f   :  { %428 = shalt.err (!%p425_p10)
}
 0x120   :  { %275 = dma.vmem_to_hbm [thread:$0]  %s273_s19, 128, %s518_s6, [#allocation10]  }
 0x121   :  { %441 = dma.done.wait [#allocation4], 128  }
 0x122   :  { %442 = vsyncadd [#allocation4], 4294967168 }
 0x123   :  { %443 = dma.done.wait [#allocation10], 128  }
 0x124   :  { %444 = vsyncadd [#allocation10], 4294967168 }
 0x125   :  { %282 = vsyncpa [#allocation3], 1 }
 0x126   :  { %283 = vsyncpa [#allocation6], 1 }
 0x127   :  { %284 = vsyncpa [#allocation4], 1 }
 0x128   :  { %285 = vsyncpa [#allocation10], 1 }

</bundles_post_ra>
